<compile_context>
chip_gen: v5e
topology: v5e:2x2
jax: 0.10.0
libtpu: 0.0.40
codegen_flags: <defaults>
</compile_context>

<pallas_src>
import functools

import jax
import jax.numpy as jnp
import numpy as np
from jax.experimental import pallas as pl
from jax.experimental.pallas import tpu as pltpu


def _numerical_loss_kernel(op_ref, j1_ref, j2_ref, out_ref, *,
                           eq_idx, lt_idx, gt_idx):
    op = op_ref[...]                                  # (TB, 1) int32
    j1 = j1_ref[...].astype(jnp.float32)              # (TB, D)
    j2 = j2_ref[...].astype(jnp.float32)              # (TB, D)

    eq_b = op == eq_idx                               # (TB, 1) row masks
    lt_b = op == lt_idx
    gt_b = op == gt_idx

    # ||a-b||^2 = ||a||^2 + ||b||^2 - 2*a.b : three row reductions, no
    # full-width (TB, D) difference temporary.
    s11 = jnp.sum(j1 * j1, axis=1, keepdims=True)     # (TB, 1)
    s22 = jnp.sum(j2 * j2, axis=1, keepdims=True)
    s12 = jnp.sum(j1 * j2, axis=1, keepdims=True)
    sq_row = s11 + s22 - 2.0 * s12
    n1 = jnp.sqrt(s11)
    n2 = jnp.sqrt(s22)

    zero = jnp.zeros_like(sq_row)
    # Select (not multiply) so rows of a partial last tile (masked out via the
    # op sentinel padding) can never contribute NaN/Inf from unspecified VMEM.
    eq_sum = jnp.sum(jnp.where(eq_b, sq_row, zero))
    lt_sum = jnp.sum(jnp.where(lt_b, jnp.maximum(n1 - n2, 0.0), zero))
    gt_sum = jnp.sum(jnp.where(gt_b, jnp.maximum(n2 - n1, 0.0), zero))

    # One lane-aligned (1, 8, 128) partial block per grid step: sublanes
    # 0/1/2 carry eq/lt/gt.  Independent blocks -> grid axis can be parallel.
    out_ref[...] = jnp.concatenate(
        [jnp.full((1, 128), eq_sum, jnp.float32),
         jnp.full((1, 128), lt_sum, jnp.float32),
         jnp.full((1, 128), gt_sum, jnp.float32),
         jnp.zeros((5, 128), jnp.float32)],
        axis=0)[None]


def _vmem_limit_bytes():
    try:
        phys = int(pltpu.get_tpu_info().vmem_capacity_bytes)
    except Exception:
        phys = 64 * 1024 * 1024            # v7x-conservative fallback
    return max(32 * 1024 * 1024, min(96 * 1024 * 1024, (phys * 3) // 4))


def _choose_block_rows(batch, embed_dim, itemsize, vmem_limit):
    itemsize = max(int(itemsize), 1)
    # Sublane multiple for the input dtype packing (8 f32 / 16 bf16 / 32 i8).
    sub = max(8, 32 // itemsize)
    # Per-row working set:
    #   inputs:    2 arrays x 2 pipeline buffers x D x itemsize
    #   f32 temps: ~4 x D x 4 bytes (casts + products) inside the kernel
    per_row = embed_dim * (4 * itemsize + 16)
    tb = (vmem_limit // 2) // per_row                      # ~half of scoped VMEM
    # Keep each per-input DMA slab in the 2-8 MiB sweet spot.
    tb = min(tb, (8 * 1024 * 1024) // (embed_dim * itemsize))
    tb = min(tb, -(-batch // sub) * sub)                   # no bigger than batch
    return max(sub, (int(tb) // sub) * sub)


def numerical_loss(joint1_embedding, joint2_embedding, operation,
                   operation_to_idx, alpha=1.2, beta=0.7, block_rows=None):
    B, D = joint1_embedding.shape
    eq_idx = int(operation_to_idx['='])
    lt_idx = int(operation_to_idx['<'])
    gt_idx = int(operation_to_idx['>'])

    itemsize = jnp.dtype(joint1_embedding.dtype).itemsize
    vmem_limit = _vmem_limit_bytes()
    if block_rows is None:
        tb = _choose_block_rows(B, D, itemsize, vmem_limit)
    else:
        tb = max(8, (int(block_rows) // 8) * 8)
    num_tiles = -(-B // tb)
    b_pad = num_tiles * tb

    # Row-operation labels, shaped (B, 1) so they broadcast over rows.  Pad to
    # a whole number of tiles with a sentinel matching no operation index, so
    # padded / unspecified rows contribute nothing (via in-kernel jnp.where).
    op2d = operation.reshape(B, 1).astype(jnp.int32)
    if b_pad != B:
        sentinel = min(eq_idx, lt_idx, gt_idx) - 1
        op2d = jnp.pad(op2d, ((0, b_pad - B), (0, 0)), constant_values=sentinel)

    kernel = functools.partial(_numerical_loss_kernel,
                               eq_idx=eq_idx, lt_idx=lt_idx, gt_idx=gt_idx)

    cost = pl.CostEstimate(
        flops=7 * B * D,
        transcendentals=2 * B,
        bytes_accessed=2 * B * D * int(itemsize) + B * 4
                       + num_tiles * 8 * 128 * 4,
    )

    partials = pl.pallas_call(
        kernel,
        out_shape=jax.ShapeDtypeStruct((num_tiles, 8, 128), jnp.float32),
        grid_spec=pltpu.PrefetchScalarGridSpec(
            num_scalar_prefetch=0,
            grid=(num_tiles,),
            in_specs=[
                pl.BlockSpec((tb, 1), lambda i: (i, 0)),   # op  (TB, 1)
                pl.BlockSpec((tb, D), lambda i: (i, 0)),   # j1  (TB, D)
                pl.BlockSpec((tb, D), lambda i: (i, 0)),   # j2  (TB, D)
            ],
            out_specs=pl.BlockSpec((1, 8, 128), lambda i: (i, 0, 0)),
        ),
        compiler_params=pltpu.CompilerParams(
            dimension_semantics=("parallel",),
            vmem_limit_bytes=vmem_limit,
        ),
        cost_estimate=cost,
    )(op2d, joint1_embedding, joint2_embedding)

    eq_sum = jnp.sum(partials[:, 0, 0])
    lt_sum = jnp.sum(partials[:, 1, 0])
    gt_sum = jnp.sum(partials[:, 2, 0])

    # Mask row counts depend only on the tiny op vector -> wrapper-side.
    eq_cnt = jnp.sum((operation == eq_idx).astype(jnp.float32))
    lt_cnt = jnp.sum((operation == lt_idx).astype(jnp.float32))
    gt_cnt = jnp.sum((operation == gt_idx).astype(jnp.float32))

    # F.mse_loss over the '=' selection: sum / (#rows * D).  Intentionally
    # unguarded (NaN when no '=' rows), matching the PyTorch module.
    eq_loss = eq_sum / (eq_cnt * jnp.float32(D))
    lt_mean = lt_sum / jnp.maximum(lt_cnt, 1.0)
    gt_mean = gt_sum / jnp.maximum(gt_cnt, 1.0)

    # Reproduce the data-dependent branching: a term is dropped entirely when
    # its mask is empty; otherwise beta * mean(relu(...)).
    total = alpha * eq_loss
    total = total + jnp.where(lt_cnt > 0, beta * lt_mean, jnp.float32(0.0))
    total = total + jnp.where(gt_cnt > 0, beta * gt_mean, jnp.float32(0.0))
    return total


def _reference_loss(j1, j2, op, op_to_idx, alpha, beta):
    j1 = np.asarray(j1, dtype=np.float64)
    j2 = np.asarray(j2, dtype=np.float64)
    op = np.asarray(op)
    eq = op == op_to_idx['=']
    lt = op == op_to_idx['<']
    gt = op == op_to_idx['>']
    eq_loss = np.mean((j1[eq] - j2[eq]) ** 2)
    n1 = np.linalg.norm(j1, axis=1)
    n2 = np.linalg.norm(j2, axis=1)
    total = alpha * eq_loss
    if lt.any():
        total += beta * np.mean(np.maximum((n1 - n2)[lt], 0.0))
    if gt.any():
        total += beta * np.mean(np.maximum((n2 - n1)[gt], 0.0))
    return total


if __name__ == "__main__":
    operation_to_idx = {'=': 0, '<': 1, '>': 2}
    alpha, beta = 1.2, 0.7
    key = jax.random.PRNGKey(0)

    # Case 1: small, single tile (B=8, D=32).
    B, D = 8, 32
    k1, k2, key = jax.random.split(key, 3)
    joint1 = jax.random.normal(k1, (B, D), dtype=jnp.float32)
    joint2 = jax.random.normal(k2, (B, D), dtype=jnp.float32)
    operation = jnp.array([0, 1, 2, 0, 1, 2, 0, 1], dtype=jnp.int32)

    loss = numerical_loss(joint1, joint2, operation, operation_to_idx,
                          alpha=alpha, beta=beta)
    loss = jax.block_until_ready(loss)
    ref = _reference_loss(joint1, joint2, operation, operation_to_idx,
                          alpha, beta)
    assert np.allclose(np.asarray(loss), ref, rtol=1e-5, atol=1e-5), \
        f"case1 mismatch: pallas={float(loss)} ref={float(ref)}"

    # Case 2: multi-tile grid + padded last tile + empty '>' mask
    # (B=12 with block_rows=8 -> 2 tiles, 4 padded rows).
    B2, D2 = 12, 256
    k1, k2, key = jax.random.split(key, 3)
    joint1b = jax.random.normal(k1, (B2, D2), dtype=jnp.float32)
    joint2b = jax.random.normal(k2, (B2, D2), dtype=jnp.float32)
    operation_b = jnp.array([0, 1, 0, 0, 1, 1, 0, 0, 1, 0, 0, 1],
                            dtype=jnp.int32)

    loss2 = numerical_loss(joint1b, joint2b, operation_b, operation_to_idx,
                           alpha=alpha, beta=beta, block_rows=8)
    loss2 = jax.block_until_ready(loss2)
    ref2 = _reference_loss(joint1b, joint2b, operation_b, operation_to_idx,
                           alpha, beta)
    assert np.allclose(np.asarray(loss2), ref2, rtol=1e-5, atol=1e-5), \
        f"case2 mismatch: pallas={float(loss2)} ref={float(ref2)}"

    print("KERNEL_OK")
</pallas_src>

<mosaic_0001>
module attributes {stable_mosaic.version = 11 : i64} {
  func.func @_numerical_loss_kernel(%arg0: i32, %arg1: memref<8x1xi32, #tpu.memory_space<vmem>>, %arg2: memref<8x32xf32, #tpu.memory_space<vmem>>, %arg3: memref<8x32xf32, #tpu.memory_space<vmem>>, %arg4: memref<1x8x128xf32, #tpu.memory_space<vmem>>) attributes {dimension_semantics = [#tpu.dimension_semantics<parallel>], iteration_bounds = array<i64: 1>, scalar_prefetch = 0 : i64, scratch_operands = 0 : i64, tpu.core_type = #tpu.core_type<tc>, window_params = [{transform_indices = @transform_0, window_bounds = array<i64: 8, 1>}, {transform_indices = @transform_1, window_bounds = array<i64: 8, 32>}, {transform_indices = @transform_2, window_bounds = array<i64: 8, 32>}, {transform_indices = @transform_3, window_bounds = array<i64: 1, 8, 128>}]} {
    %c0 = arith.constant 0 : index
    %c0_0 = arith.constant 0 : index
    %0 = vector.load %arg1[%c0, %c0_0] : memref<8x1xi32, #tpu.memory_space<vmem>>, vector<8x1xi32>
    %c0_1 = arith.constant 0 : index
    %c0_2 = arith.constant 0 : index
    %1 = vector.load %arg2[%c0_1, %c0_2] : memref<8x32xf32, #tpu.memory_space<vmem>>, vector<8x32xf32>
    %c0_3 = arith.constant 0 : index
    %c0_4 = arith.constant 0 : index
    %2 = vector.load %arg3[%c0_3, %c0_4] : memref<8x32xf32, #tpu.memory_space<vmem>>, vector<8x32xf32>
    %c0_i32 = arith.constant 0 : i32
    %3 = vector.broadcast %c0_i32 : i32 to vector<8x1xi32>
    %4 = arith.cmpi eq, %0, %3 : vector<8x1xi32>
    %c1_i32 = arith.constant 1 : i32
    %5 = vector.broadcast %c1_i32 : i32 to vector<8x1xi32>
    %6 = arith.cmpi eq, %0, %5 : vector<8x1xi32>
    %c2_i32 = arith.constant 2 : i32
    %7 = vector.broadcast %c2_i32 : i32 to vector<8x1xi32>
    %8 = arith.cmpi eq, %0, %7 : vector<8x1xi32>
    %9 = arith.mulf %1, %1 : vector<8x32xf32>
    %cst = arith.constant dense<0.000000e+00> : vector<8xf32>
    %10 = vector.multi_reduction <add>, %9, %cst [1] : vector<8x32xf32> to vector<8xf32>
    %11 = vector.shape_cast %10 : vector<8xf32> to vector<8x1xf32>
    %12 = arith.mulf %2, %2 : vector<8x32xf32>
    %cst_5 = arith.constant dense<0.000000e+00> : vector<8xf32>
    %13 = vector.multi_reduction <add>, %12, %cst_5 [1] : vector<8x32xf32> to vector<8xf32>
    %14 = vector.shape_cast %13 : vector<8xf32> to vector<8x1xf32>
    %15 = arith.mulf %1, %2 : vector<8x32xf32>
    %cst_6 = arith.constant dense<0.000000e+00> : vector<8xf32>
    %16 = vector.multi_reduction <add>, %15, %cst_6 [1] : vector<8x32xf32> to vector<8xf32>
    %17 = vector.shape_cast %16 : vector<8xf32> to vector<8x1xf32>
    %18 = arith.addf %11, %14 : vector<8x1xf32>
    %cst_7 = arith.constant 2.000000e+00 : f32
    %19 = vector.broadcast %cst_7 : f32 to vector<8x1xf32>
    %20 = arith.mulf %19, %17 : vector<8x1xf32>
    %21 = arith.subf %18, %20 : vector<8x1xf32>
    %22 = math.sqrt %11 : vector<8x1xf32>
    %23 = math.sqrt %14 : vector<8x1xf32>
    %cst_8 = arith.constant 0.000000e+00 : f32
    %24 = vector.broadcast %cst_8 : f32 to vector<8x1xf32>
    %25 = arith.select %4, %21, %24 : vector<8x1xi1>, vector<8x1xf32>
    %26 = vector.shape_cast %25 : vector<8x1xf32> to vector<1x8x1xf32>
    %cst_9 = arith.constant dense<0.000000e+00> : vector<1xf32>
    %27 = vector.multi_reduction <add>, %26, %cst_9 [1, 2] : vector<1x8x1xf32> to vector<1xf32>
    %28 = vector.shape_cast %27 : vector<1xf32> to vector<1x1x1xf32>
    %29 = vector.extract %28[0, 0, 0] : f32 from vector<1x1x1xf32>
    %30 = arith.subf %22, %23 : vector<8x1xf32>
    %cst_10 = arith.constant 0.000000e+00 : f32
    %31 = vector.broadcast %cst_10 : f32 to vector<8x1xf32>
    %32 = arith.maximumf %30, %31 : vector<8x1xf32>
    %33 = arith.select %6, %32, %24 : vector<8x1xi1>, vector<8x1xf32>
    %34 = vector.shape_cast %33 : vector<8x1xf32> to vector<1x8x1xf32>
    %cst_11 = arith.constant dense<0.000000e+00> : vector<1xf32>
    %35 = vector.multi_reduction <add>, %34, %cst_11 [1, 2] : vector<1x8x1xf32> to vector<1xf32>
    %36 = vector.shape_cast %35 : vector<1xf32> to vector<1x1x1xf32>
    %37 = vector.extract %36[0, 0, 0] : f32 from vector<1x1x1xf32>
    %38 = arith.subf %23, %22 : vector<8x1xf32>
    %cst_12 = arith.constant 0.000000e+00 : f32
    %39 = vector.broadcast %cst_12 : f32 to vector<8x1xf32>
    %40 = arith.maximumf %38, %39 : vector<8x1xf32>
    %41 = arith.select %8, %40, %24 : vector<8x1xi1>, vector<8x1xf32>
    %42 = vector.shape_cast %41 : vector<8x1xf32> to vector<1x8x1xf32>
    %cst_13 = arith.constant dense<0.000000e+00> : vector<1xf32>
    %43 = vector.multi_reduction <add>, %42, %cst_13 [1, 2] : vector<1x8x1xf32> to vector<1xf32>
    %44 = vector.shape_cast %43 : vector<1xf32> to vector<1x1x1xf32>
    %45 = vector.extract %44[0, 0, 0] : f32 from vector<1x1x1xf32>
    %46 = vector.broadcast %29 : f32 to vector<1x128xf32>
    %47 = vector.broadcast %37 : f32 to vector<1x128xf32>
    %48 = vector.broadcast %45 : f32 to vector<1x128xf32>
    %cst_14 = arith.constant 0.000000e+00 : f32
    %49 = vector.broadcast %cst_14 : f32 to vector<5x128xf32>
    %50 = tpu.concatenate %46, %47, %48, %49 in 0 : vector<1x128xf32>, vector<1x128xf32>, vector<1x128xf32>, vector<5x128xf32> -> vector<8x128xf32>
    %51 = vector.shape_cast %50 : vector<8x128xf32> to vector<1x8x128xf32>
    %c0_15 = arith.constant 0 : index
    %c0_16 = arith.constant 0 : index
    %c0_17 = arith.constant 0 : index
    %52 = vector.load %arg4[%c0_15, %c0_16, %c0_17] : memref<1x8x128xf32, #tpu.memory_space<vmem>>, vector<1x8x128xf32>
    tpu.vector_store %arg4[%c0_15, %c0_16, %c0_17], %51 {strides = array<i32>} : memref<1x8x128xf32, #tpu.memory_space<vmem>>, vector<1x8x128xf32>,
    return
  }
  func.func @transform_0(%arg0: i32) -> (i32, i32) {
    %c0_i32 = arith.constant 0 : i32
    %c0_i32_0 = arith.constant 0 : i32
    return %arg0, %c0_i32 : i32, i32
  }
  func.func @transform_1(%arg0: i32) -> (i32, i32) {
    %c0_i32 = arith.constant 0 : i32
    %c0_i32_0 = arith.constant 0 : i32
    return %arg0, %c0_i32 : i32, i32
  }
  func.func @transform_2(%arg0: i32) -> (i32, i32) {
    %c0_i32 = arith.constant 0 : i32
    %c0_i32_0 = arith.constant 0 : i32
    return %arg0, %c0_i32 : i32, i32
  }
  func.func @transform_3(%arg0: i32) -> (i32, i32, i32) {
    %c0_i32 = arith.constant 0 : i32
    %c0_i32_0 = arith.constant 0 : i32
    %c0_i32_1 = arith.constant 0 : i32
    return %arg0, %c0_i32, %c0_i32_0 : i32, i32, i32
  }
}

</mosaic_0001>

<bundles_post_ra>
// kernel: tpu_custom_call.1
= control target key start
LH: loop header
LB: loop body
LE: loop exit
PB: predicated region body
PF: predicated region fallthrough
CT: control target
= control target key end

     0   :  { %8 = vsyncpa [#allocation3], 0  ;;  %s241_s0 = inlined_call_operand.vmem [shape: s32[8,1], index: 0, kind: input, shape index: {}]   ;;  %s242_s1 = inlined_call_operand.vmem [shape: f32[8,32], index: 1, kind: input, shape index: {}]   ;;  %s243_s2 = inlined_call_operand.hbm [shape: f32[8,32], index: 2, kind: input, shape index: {}]   ;;  %s244_s3 = inlined_call_operand.hbm [shape: f32[1,8,128], index: 3, kind: output, shape index: {}]  }
   0x1   :  { %9 = vsyncpa [#allocation4], 0  ;;  %s19_s14 = sshll.u32 %s243_s2, 4  ;;  %s204_s15 = smov [#allocation2]   ;;  %s20_s14 = int_to_ptr.hbm [resolvable:$true] %s19_s14 }
   0x2   :  { %s21_s16 = sshll.u32 %s204_s15, 4  ;;  %s22_s16 = int_to_ptr.vmem [resolvable:$true] %s21_s16 }
   0x3   :  { %24 = dma.hbm_to_vmem [thread:$0]  %s20_s14, 128, %s22_s16, [#allocation3]  }
   0x4   :  { %200 = dma.done.wait [#allocation3], 128  }
   0x5   :  { %201 = vsyncadd [#allocation3], 4294967168  ;;  %v30_v0 = vld [vmem:[%s242_s1] sm:$0xff]  ;;  %vm36_vm0 = vcmask 261120   ;;  %vm76_vm2 = vcmask 7168   ;;  %vm116_vm9 = vcmask 1040384  }
   0x6   :  { %v31_v1 = vld [vmem:[#allocation2] sm:$0xff]  ;;  %v35_v2 = vmul.f32 %v30_v0, %v30_v0  ;;  %vm118_vm10 = vcmask 1041408   ;;  %s205_s20 = smov [#allocation5]   ;;  %s130_s24 = sshll.u32 %s244_s3, 4  ;;  %vm120_vm11 = vcmask 1042432   ;;  %s131_s24 = int_to_ptr.hbm [resolvable:$true] %s130_s24 }
   0x7   :  { %v44_v3 = vmul.f32 %v31_v1, %v30_v0  ;;  %v40_v6 = vmul.f32 %v31_v1, %v31_v1  ;;  %v29_v12 = vld [vmem:[%s241_s0] sm:$0xff]  ;;  %s128_s21 = sshll.u32 %s205_s20, 4  ;;  %s129_s21 = int_to_ptr.vmem [resolvable:$true] %s128_s21 }
   0x8   :  { %v37_v4 = vsel %vm36_vm0, %v35_v2, 0.0  ;;  %vm32_vm1 = vcmp.eq.s32.totalorder %v29_v12, 0  ;;  %vm33_vm7 = vcmp.eq.s32.totalorder %v29_v12, 1  ;;  %vm34_vm8 = vcmp.eq.s32.totalorder %v29_v12, 2 }
   0x9   :  { %v45_v5 = vsel %vm36_vm0, %v44_v3, 0.0  ;;  %38 = vadd.xlane.f32.xlu0 %v37_v4  ;;  %v41_v7 = vsel %vm36_vm0, %v40_v6, 0.0 }
   0xa   :  { %46 = vadd.xlane.f32.xlu1 %v45_v5 }
  0x11   :  { %42 = vadd.xlane.f32.xlu0 %v41_v7 }
  0x7c   :  { %v39_v8 = vpop.xlane.xlu0 %38 }
  0x7d   :  { %148 = vrsqrt.f32 %v39_v8  ;;  %v47_v9 = vpop.xlane.xlu1 %46  ;;  %vm58_vm3 = vcmp.eq.f32.partialorder %v39_v8, inf  ;;  %v61_v32 = vand.u32 2147483648, %v39_v8  ;;  %vm60_vm5 = vcmp.eq.f32.partialorder %v39_v8, 0.0 }
  0x7e   :  { %v49_v11 = vmul.f32 2.0, %v47_v9 }
  0x83   :  { %v149_v10 = vpop.eup %148 }
  0x84   :  { %v43_v13 = vpop.xlane.xlu0 %42  ;;  %v52_v14 = vmul.f32 %v149_v10, %v39_v8 }
  0x85   :  { %150 = vrsqrt.f32 %v43_v13  ;;  %v48_v15 = vadd.f32 %v43_v13, %v39_v8  ;;  %vm70_vm4 = vcmp.eq.f32.partialorder %v43_v13, inf  ;;  %v73_v33 = vand.u32 2147483648, %v43_v13 }
  0x86   :  { %v53_v16 = vmul.f32 %v149_v10, %v52_v14  ;;  %vm72_vm6 = vcmp.eq.f32.partialorder %v43_v13, 0.0 }
  0x87   :  { %v50_v17 = vsub.f32 %v48_v15, %v49_v11 }
  0x88   :  { %v54_v18 = vmul.f32 0.5, %v53_v16 }
  0x89   :  { %v75_v19 = vsel %vm32_vm1, %v50_v17, 0.0 }
  0x8a   :  { %v77_v20 = vsel %vm76_vm2, %v75_v19, 0.0  ;;  %v55_v21 = vsub.f32 1.5, %v54_v18 }
  0x8b   :  { %v151_v22 = vpop.eup %150  ;;  %78 = vadd.xlane.f32.xlu1 %v77_v20 }
  0x8c   :  { %v64_v23 = vmul.f32 %v151_v22, %v43_v13  ;;  %v56_v24 = vmul.f32 %v149_v10, %v55_v21 }
  0x8e   :  { %v65_v25 = vmul.f32 %v151_v22, %v64_v23  ;;  %v57_v27 = vmul.f32 %v56_v24, %v39_v8 }
  0x90   :  { %v66_v26 = vmul.f32 0.5, %v65_v25  ;;  %v59_v30 = vsel %vm58_vm3, %v39_v8, %v57_v27 }
  0x91   :  { %v62_v35 = vsel %vm60_vm5, %v61_v32, %v59_v30 }
  0x92   :  { %v67_v28 = vsub.f32 1.5, %v66_v26 }
  0x94   :  { %v68_v29 = vmul.f32 %v151_v22, %v67_v28 }
  0x96   :  { %v69_v31 = vmul.f32 %v68_v29, %v43_v13 }
  0x98   :  { %v71_v34 = vsel %vm70_vm4, %v43_v13, %v69_v31 }
  0x99   :  { %v74_v36 = vsel %vm72_vm6, %v73_v33, %v71_v34 }
  0x9a   :  { %v87_v37 = vsub.f32 %v62_v35, %v74_v36  ;;  %v100_v39 = vsub.f32 %v74_v36, %v62_v35 }
  0x9c   :  { %v88_v38 = vmax.f32 %v87_v37, 0.0  ;;  %v101_v42 = vmax.f32 %v100_v39, 0.0 }
  0x9e   :  { %v89_v40 = vsel %vm33_vm7, %v88_v38, 0.0  ;;  %v102_v43 = vsel %vm34_vm8, %v101_v42, 0.0 }
  0x9f   :  { %v90_v41 = vsel %vm76_vm2, %v89_v40, 0.0  ;;  %v103_v44 = vsel %vm76_vm2, %v102_v43, 0.0 }
  0xa0   :  { %91 = vadd.xlane.f32.xlu2 %v90_v41 }
  0xa8   :  { %104 = vadd.xlane.f32.xlu2 %v103_v44 }
  0xfe   :  { %v79_v45 = vpop.xlane.xlu1 %78 }
  0xff   :  { %v80_v46 = vrot.slane %v79_v45, 4 }
 0x101   :  { %v81_v47 = vadd.f32 %v80_v46, %v79_v45 }
 0x103   :  { %v82_v48 = vrot.slane %v81_v47, 2 }
 0x105   :  { %v83_v49 = vadd.f32 %v82_v48, %v81_v47 }
 0x107   :  { %v84_v50 = vrot.slane %v83_v49, 1 }
 0x109   :  { %v85_v51 = vadd.f32 %v84_v50, %v83_v49 }
 0x10b   :  { %140 = vpush %v85_v51 }
 0x113   :  { %v92_v52 = vpop.xlane.xlu2 %91 }
 0x114   :  { %v93_v53 = vrot.slane %v92_v52, 4 }
 0x116   :  { %v94_v54 = vadd.f32 %v93_v53, %v92_v52 }
 0x118   :  { %v95_v55 = vrot.slane %v94_v54, 2 }
 0x11a   :  { %v96_v56 = vadd.f32 %v95_v55, %v94_v54 }
 0x11b   :  { %v105_v57 = vpop.xlane.xlu2 %104 }
 0x11c   :  { %v106_v58 = vrot.slane %v105_v57, 4  ;;  %v97_v59 = vrot.slane %v96_v56, 1 }
 0x11e   :  { %v107_v60 = vadd.f32 %v106_v58, %v105_v57  ;;  %v98_v61 = vadd.f32 %v97_v59, %v96_v56 }
 0x120   :  { %v108_v62 = vrot.slane %v107_v60, 2  ;;  %142 = vpush %v98_v61 }
 0x122   :  { %v109_v63 = vadd.f32 %v108_v62, %v107_v60 }
 0x124   :  { %v110_v0 = vrot.slane %v109_v63, 1 }
 0x126   :  { %v111_v1 = vadd.f32 %v110_v0, %v109_v63 }
 0x128   :  { %144 = vpush %v111_v1 }
 0x13c   :  { %s141_s0 = spop %140 }
 0x13d   :  { %v113_v3 = vstv %s141_s0 }
 0x151   :  { %s143_s1 = spop %142 }
 0x152   :  { %v114_v2 = vstv %s143_s1 }
 0x153   :  { %v117_v4 = vsel %vm116_vm9, %v113_v3, %v114_v2 }
 0x159   :  { %s145_s25 = spop %144 }
 0x15a   :  { %v115_v5 = vstv %s145_s25 }
 0x15b   :  { %v119_v6 = vsel %vm118_vm10, %v117_v4, %v115_v5 }
 0x15c   :  { %v121_v7 = vsel %vm120_vm11, %v119_v6, 0.0 }
 0x15d   :  { %122 = vst [vmem:[#allocation5] sm:$0xff] %v121_v7 }
 0x15e   :  { %133 = dma.vmem_to_hbm [thread:$0]  %s129_s21, 128, %s131_s24, [#allocation4]  }
 0x15f   :  { %202 = dma.done.wait [#allocation4], 128  }
 0x160   :  { %203 = vsyncadd [#allocation4], 4294967168 }
 0x161   :  { %138 = vsyncpa [#allocation3], 1 }
 0x162   :  { %139 = vsyncpa [#allocation4], 1 }

</bundles_post_ra>
